<compile_context>
chip_gen: v5e
topology: v5e:2x2
jax: 0.10.0
libtpu: 0.0.40
codegen_flags: <defaults>
</compile_context>

<pallas_src>
import jax
import jax.numpy as jnp
from jax.experimental import pallas as pl
from jax.experimental.pallas import tpu as pltpu


# ---------------------------------------------------------------------------
# Kernels
# ---------------------------------------------------------------------------

def _swiglu_kernel_resident(x_ref, w13_ref, w2_ref, o_ref):
    """o = (silu(x@W1) * (x@W3)) @ W2 with [W1^T | W3^T] fused and fully resident."""
    D = w2_ref.shape[0]
    h = jnp.dot(x_ref[...], w13_ref[...], preferred_element_type=jnp.float32)  # (tm, 2D)
    h1 = h[:, :D]
    h3 = h[:, D:]
    gated = h1 * jax.nn.sigmoid(h1) * h3                                        # f32 VPU/EUP
    o_ref[...] = jnp.dot(gated.astype(w2_ref.dtype), w2_ref[...],
                         preferred_element_type=jnp.float32).astype(o_ref.dtype)
    # TODO(synk): training-mode dropout would need pltpu.prng_seed/prng_random_bits.


def _swiglu_kernel_hidden_tiled(x_ref, w13i_ref, w2_ref, o_ref, acc_ref):
    """Hidden dim tiled: grid=(rows, hidden); f32 scratch accumulates the output tile.

    w13i_ref holds the interleaved [W1^T cols | W3^T cols] for this hidden chunk,
    so the gate projection is a single full-width MXU matmul.
    """
    th = w2_ref.shape[0]
    h_idx = pl.program_id(1)

    @pl.when(h_idx == 0)
    def _():
        acc_ref[...] = jnp.zeros_like(acc_ref)

    h = jnp.dot(x_ref[...], w13i_ref[...], preferred_element_type=jnp.float32)  # (tm, 2*th)
    h1 = h[:, :th]
    h3 = h[:, th:]
    gated = h1 * jax.nn.sigmoid(h1) * h3
    acc_ref[...] += jnp.dot(gated.astype(w2_ref.dtype), w2_ref[...],
                            preferred_element_type=jnp.float32)                  # (tm, D)

    @pl.when(h_idx == pl.num_programs(1) - 1)
    def _():
        o_ref[...] = acc_ref[...].astype(o_ref.dtype)


# ---------------------------------------------------------------------------
# Host-side helpers
# ---------------------------------------------------------------------------

def _round_up(n, m):
    return ((n + m - 1) // m) * m


def _auto_vmem_budget():
    """Generation-aware VMEM budget for path selection / vmem_limit."""
    phys = 64 * 2**20
    try:
        info = pltpu.get_tpu_info()
        phys = int(getattr(info, "vmem_capacity_bytes", phys))
    except Exception:
        pass
    if phys >= 100 * 2**20:          # v5e / v6e: 128 MiB physical VMEM
        return 104 * 2**20
    return 52 * 2**20                # v7x: 64 MiB physical -> leave compiler headroom


def _resident_vmem_bytes(tm, D, x_b, w_b, o_b, single_buffer_weights):
    wmul = 1 if single_buffer_weights else 2
    weights = wmul * 3 * D * D * w_b          # fused (D,2D) gate + (D,D) down-proj
    tiles = 2 * tm * D * (x_b + o_b)          # double-buffered x / out row tiles
    interm = 4 * tm * D * 4                   # h(2D) + gated(D) + slack, f32
    return weights + tiles + interm


def _tiled_vmem_bytes(tm, D, th, x_b, w_b, o_b):
    weights = 2 * 3 * D * th * w_b            # streamed (double-buffered) w13i + w2 tiles
    tiles = 2 * tm * D * (x_b + o_b)
    acc = tm * D * 4
    interm = 4 * tm * th * 4
    return weights + tiles + acc + interm


def prepare_swiglu_params(w1, w2, w3, *, matmul_dtype=jnp.bfloat16, gate_chunk=None):
    """One-time weight preparation (transpose, cast, pad D to 128, fuse / interleave W1|W3).

    Call this ONCE at parameter-init time and reuse the result; it hoists all
    per-call weight reshuffling out of the hot path.
    """
    n_dim = w1.shape[0]
    dtype = jnp.dtype(matmul_dtype)
    d_pad = _round_up(n_dim, 128)
    pad = d_pad - n_dim

    w1t = jnp.asarray(w1).T.astype(dtype)
    w2t = jnp.asarray(w2).T.astype(dtype)
    w3t = jnp.asarray(w3).T.astype(dtype)
    if pad:
        w1t = jnp.pad(w1t, ((0, pad), (0, pad)))
        w2t = jnp.pad(w2t, ((0, pad), (0, pad)))
        w3t = jnp.pad(w3t, ((0, pad), (0, pad)))

    if gate_chunk is None:
        gate_chunk = 256 if d_pad % 256 == 0 else 128
    assert gate_chunk % 128 == 0 and d_pad % gate_chunk == 0

    # Resident-path gate weight: plain [W1^T | W3^T] -> one (D, 2D) wide MXU matmul,
    # halves split by free lane-aligned slices.
    w13t = jnp.concatenate([w1t, w3t], axis=1)

    # Tiled-path gate weight: interleave per gate_chunk so the h-th W1 column tile
    # sits next to the h-th W3 column tile -> single (D, 2*th) fetch + matmul.
    nc = d_pad // gate_chunk
    w13i = jnp.concatenate(
        [w1t.reshape(d_pad, nc, gate_chunk), w3t.reshape(d_pad, nc, gate_chunk)],
        axis=2).reshape(d_pad, 2 * d_pad)

    # TODO(synk): optional fp8 weight path (per-output-channel scales) for v7x.
    return {"n_dim": n_dim, "d_pad": d_pad, "dtype": dtype, "gate_chunk": gate_chunk,
            "w13t": w13t, "w13i": w13i, "w2t": w2t}


def swiglu_ffn_prepared(x, params, *, tm=256, vmem_budget_bytes=None,
                        force_hidden_tiling=False, single_buffer_weights=True):
    """Run the SwiGLU FFN with pre-prepared weights. Returns same shape/dtype as x."""
    orig_shape = x.shape
    D = orig_shape[-1]
    assert D == params["n_dim"], "weight / input dim mismatch"
    D_pad = params["d_pad"]
    w_dtype = params["dtype"]

    if vmem_budget_bytes is None:
        vmem_budget_bytes = _auto_vmem_budget()

    xm = x.reshape(-1, D)
    M = xm.shape[0]
    out_dtype = x.dtype

    x_b = jnp.dtype(w_dtype).itemsize       # activations are cast to the matmul dtype
    w_b = x_b
    o_b = jnp.dtype(out_dtype).itemsize

    # Sublane packing requirement for the row (second-minor) dim of x / out tiles.
    sub = max(8 * 4 // x_b, 8 * 4 // o_b, 8)

    # --- resident-path row tile; prefer >=2 row tiles so the "parallel" axis can be
    # sharded across the two v7x TensorCores ---
    tm_eff = max(sub, _round_up(min(tm, _round_up(M, sub)), sub))
    if _round_up(M, tm_eff) // tm_eff < 2 and M >= 2 * sub:
        tm_eff = _round_up(pl.cdiv(M, 2), sub)
    M_pad = _round_up(M, tm_eff)

    need_resident = _resident_vmem_bytes(tm_eff, D_pad, x_b, w_b, o_b,
                                         single_buffer_weights)
    use_tiled = force_hidden_tiling or need_resident > vmem_budget_bytes

    th = params["gate_chunk"]
    if use_tiled:
        # Bigger row tile amortizes per-row-tile weight re-streaming
        # ((M/tm) * 3*D^2 bytes of HBM traffic); shrink only if VMEM disallows it.
        cand = _round_up(min(max(tm, 512), _round_up(M, sub)), sub)
        while cand > sub and _tiled_vmem_bytes(cand, D_pad, th, x_b, w_b, o_b) > vmem_budget_bytes:
            cand = max(sub, _round_up(cand // 2, sub))
        tm_eff = cand
        M_pad = _round_up(M, tm_eff)

    # Pad rows / feature dim, and cast activations to the matmul dtype once
    # (outside the kernel) so the hot loop never re-casts the resident x tile.
    pad_r = M_pad - M
    pad_c = D_pad - D
    if pad_r or pad_c:
        xm = jnp.pad(xm, ((0, pad_r), (0, pad_c)))
    xm = xm.astype(w_dtype)

    n_row_tiles = M_pad // tm_eff
    weight_bytes = 3 * D_pad * D_pad * w_b
    ce = pl.CostEstimate(
        flops=6 * M_pad * D_pad * D_pad,
        transcendentals=M_pad * D_pad,
        bytes_accessed=M_pad * D_pad * (x_b + o_b)
        + (n_row_tiles if use_tiled else 1) * weight_bytes,
    )
    out_shape = jax.ShapeDtypeStruct((M_pad, D_pad), out_dtype)
    vmem_cap = vmem_budget_bytes + (4 << 20)

    def run(single_buffer):
        if use_tiled:
            need = _tiled_vmem_bytes(tm_eff, D_pad, th, x_b, w_b, o_b)
        else:
            need = _resident_vmem_bytes(tm_eff, D_pad, x_b, w_b, o_b, single_buffer)
        vmem_limit = int(min(vmem_cap, max(32 * 2**20, need * 5 // 4 + (2 << 20))))

        def w_spec(shape, index_map):
            # Constant-index weight blocks don't need double buffering.
            if single_buffer:
                return pl.BlockSpec(shape, index_map, pipeline_mode=pl.Buffered(1))
            return pl.BlockSpec(shape, index_map)

        if use_tiled:
            nh = D_pad // th
            grid = (n_row_tiles, nh)
            in_specs = [
                pl.BlockSpec((tm_eff, D_pad), lambda i, h: (i, 0)),   # x row tile (resident over h)
                pl.BlockSpec((D_pad, 2 * th), lambda i, h: (0, h)),   # interleaved W1|W3 cols
                pl.BlockSpec((th, D_pad), lambda i, h: (h, 0)),       # W2^T rows
            ]
            out_specs = pl.BlockSpec((tm_eff, D_pad), lambda i, h: (i, 0))
            scratch = [pltpu.VMEM((tm_eff, D_pad), jnp.float32)]
            args = (xm, params["w13i"], params["w2t"])
            kernel = _swiglu_kernel_hidden_tiled
            dim_sem = ("parallel", "arbitrary")
        else:
            grid = (n_row_tiles,)
            in_specs = [
                pl.BlockSpec((tm_eff, D_pad), lambda i: (i, 0)),
                w_spec((D_pad, 2 * D_pad), lambda i: (0, 0)),         # fused W1^T|W3^T (resident)
                w_spec((D_pad, D_pad), lambda i: (0, 0)),             # W2^T (resident)
            ]
            out_specs = pl.BlockSpec((tm_eff, D_pad), lambda i: (i, 0))
            scratch = []
            args = (xm, params["w13t"], params["w2t"])
            kernel = _swiglu_kernel_resident
            dim_sem = ("parallel",)

        return pl.pallas_call(
            kernel,
            out_shape=out_shape,
            grid_spec=pltpu.PrefetchScalarGridSpec(
                num_scalar_prefetch=0,
                grid=grid,
                in_specs=in_specs,
                out_specs=out_specs,
                scratch_shapes=scratch,
            ),
            compiler_params=pltpu.CompilerParams(
                dimension_semantics=dim_sem,
                vmem_limit_bytes=vmem_limit,
            ),
            cost_estimate=ce,
        )(*args)

    if (not use_tiled) and single_buffer_weights:
        try:
            out = run(True)
        except Exception:
            # pipeline_mode=pl.Buffered(1) unsupported on this jax version: fall back
            # to default double-buffered weight blocks.
            out = run(False)
    else:
        out = run(False)

    if pad_r or pad_c:
        out = out[:M, :D]
    return out.reshape(orig_shape)


def swiglu_ffn(x, w1, w2, w3, *, matmul_dtype=jnp.bfloat16, **kwargs):
    """Convenience wrapper taking PyTorch-convention (out,in) weights.

    For repeated calls, hoist `prepare_swiglu_params` to init time and call
    `swiglu_ffn_prepared` directly.
    """
    params = prepare_swiglu_params(w1, w2, w3, matmul_dtype=matmul_dtype)
    return swiglu_ffn_prepared(x, params, **kwargs)


def swiglu_ffn_reference(x, w1, w2, w3):
    """Pure-JAX reference matching the PyTorch forward (eval mode), full f32 precision."""
    hi = jax.lax.Precision.HIGHEST
    h1 = jnp.dot(x, w1.T, precision=hi)
    h3 = jnp.dot(x, w3.T, precision=hi)
    return jnp.dot(h1 * jax.nn.sigmoid(h1) * h3, w2.T, precision=hi)


# ---------------------------------------------------------------------------
# Self-test
# ---------------------------------------------------------------------------

if __name__ == "__main__":
    def make_inputs(key, batch, seq, n_dim, dtype=jnp.float32):
        kx, k1, k2, k3 = jax.random.split(key, 4)
        x = jax.random.normal(kx, (batch, seq, n_dim), dtype=dtype)
        bound = 1.0 / (n_dim ** 0.5)
        w1 = jax.random.uniform(k1, (n_dim, n_dim), dtype, -bound, bound)
        w2 = jax.random.uniform(k2, (n_dim, n_dim), dtype, -bound, bound)
        w3 = jax.random.uniform(k3, (n_dim, n_dim), dtype, -bound, bound)
        return x, w1, w2, w3

    # 1) Resident fused-weight path, f32 matmuls (tight check of kernel math).
    x, w1, w2, w3 = make_inputs(jax.random.PRNGKey(0), 2, 8, 128)
    out = jax.block_until_ready(swiglu_ffn(x, w1, w2, w3, matmul_dtype=jnp.float32))
    ref = swiglu_ffn_reference(x, w1, w2, w3)
    assert out.shape == x.shape and out.dtype == x.dtype
    assert jnp.allclose(out, ref, atol=2e-3, rtol=2e-3), "resident f32 path mismatch"

    # 2) Resident fused-weight path, default bf16 matmuls (f32 accumulation).
    out_bf = jax.block_until_ready(swiglu_ffn(x, w1, w2, w3))
    assert out_bf.shape == x.shape and out_bf.dtype == x.dtype
    assert jnp.allclose(out_bf, ref, atol=1e-1, rtol=1e-1), "resident bf16 path mismatch"

    # 3) Hidden-dim tiled path (forced): interleaved gate weight + f32 accumulator
    #    across 2 hidden tiles (D=512, gate_chunk=256).
    x2, a1, a2, a3 = make_inputs(jax.random.PRNGKey(1), 2, 24, 512)
    p2 = prepare_swiglu_params(a1, a2, a3, matmul_dtype=jnp.float32)
    out2 = jax.block_until_ready(
        swiglu_ffn_prepared(x2, p2, force_hidden_tiling=True))
    ref2 = swiglu_ffn_reference(x2, a1, a2, a3)
    assert jnp.allclose(out2, ref2, atol=2e-3, rtol=2e-3), "tiled path mismatch"

    # 4) Ragged rows + n_dim not a multiple of 128 (row and feature padding), bf16.
    x3, b1, b2, b3 = make_inputs(jax.random.PRNGKey(2), 1, 5, 96)
    out3 = jax.block_until_ready(swiglu_ffn(x3, b1, b2, b3))
    ref3 = swiglu_ffn_reference(x3, b1, b2, b3)
    assert out3.shape == x3.shape and out3.dtype == x3.dtype
    assert jnp.allclose(out3, ref3, atol=1e-1, rtol=1e-1), "padded bf16 path mismatch"

    print("KERNEL_OK")
</pallas_src>

<mosaic_0001>
module attributes {stable_mosaic.version = 11 : i64} {
  func.func @_swiglu_kernel_resident(%arg0: i32, %arg1: memref<8x128xf32, #tpu.memory_space<vmem>>, %arg2: memref<128x256xf32, #tpu.memory_space<vmem>>, %arg3: memref<128x128xf32, #tpu.memory_space<vmem>>, %arg4: memref<8x128xf32, #tpu.memory_space<vmem>>) attributes {dimension_semantics = [#tpu.dimension_semantics<parallel>], iteration_bounds = array<i64: 2>, scalar_prefetch = 0 : i64, scratch_operands = 0 : i64, tpu.core_type = #tpu.core_type<tc>, window_params = [{transform_indices = @transform_0, window_bounds = array<i64: 8, 128>}, {pipeline_mode = #tpu.pipeline_mode<synchronous>, transform_indices = @transform_1, window_bounds = array<i64: 128, 256>}, {pipeline_mode = #tpu.pipeline_mode<synchronous>, transform_indices = @transform_2, window_bounds = array<i64: 128, 128>}, {transform_indices = @transform_3, window_bounds = array<i64: 8, 128>}]} {
    %c0 = arith.constant 0 : index
    %c0_0 = arith.constant 0 : index
    %0 = vector.load %arg1[%c0, %c0_0] : memref<8x128xf32, #tpu.memory_space<vmem>>, vector<8x128xf32>
    %c0_1 = arith.constant 0 : index
    %c0_2 = arith.constant 0 : index
    %1 = vector.load %arg2[%c0_1, %c0_2] : memref<128x256xf32, #tpu.memory_space<vmem>>, vector<128x256xf32>
    %cst = arith.constant dense<0.000000e+00> : vector<8x256xf32>
    %2 = tpu.matmul %0, %1, %cst {dimension_numbers = #tpu.dot_dimension_numbers<[1], [0], [0], [1], [0, 0, 1, 1], [], []>} : vector<8x128xf32>, vector<128x256xf32>, vector<8x256xf32> -> vector<8x256xf32>
    %3 = vector.extract_strided_slice %2 {offsets = [0, 0], sizes = [8, 128], strides = [1, 1]} : vector<8x256xf32> to vector<8x128xf32>
    %4 = vector.extract_strided_slice %2 {offsets = [0, 128], sizes = [8, 128], strides = [1, 1]} : vector<8x256xf32> to vector<8x128xf32>
    %5 = arith.negf %3 : vector<8x128xf32>
    %6 = math.exp %5 : vector<8x128xf32>
    %cst_3 = arith.constant 1.000000e+00 : f32
    %7 = vector.broadcast %cst_3 : f32 to vector<8x128xf32>
    %8 = arith.addf %7, %6 : vector<8x128xf32>
    %9 = arith.divf %7, %8 : vector<8x128xf32>
    %10 = arith.mulf %3, %9 : vector<8x128xf32>
    %11 = arith.mulf %10, %4 : vector<8x128xf32>
    %c0_4 = arith.constant 0 : index
    %c0_5 = arith.constant 0 : index
    %12 = vector.load %arg3[%c0_4, %c0_5] : memref<128x128xf32, #tpu.memory_space<vmem>>, vector<128x128xf32>
    %cst_6 = arith.constant dense<0.000000e+00> : vector<8x128xf32>
    %13 = tpu.matmul %11, %12, %cst_6 {dimension_numbers = #tpu.dot_dimension_numbers<[1], [0], [0], [1], [0, 0, 1, 1], [], []>} : vector<8x128xf32>, vector<128x128xf32>, vector<8x128xf32> -> vector<8x128xf32>
    %c0_7 = arith.constant 0 : index
    %c0_8 = arith.constant 0 : index
    %14 = vector.load %arg4[%c0_7, %c0_8] : memref<8x128xf32, #tpu.memory_space<vmem>>, vector<8x128xf32>
    tpu.vector_store %arg4[%c0_7, %c0_8], %13 {strides = array<i32>} : memref<8x128xf32, #tpu.memory_space<vmem>>, vector<8x128xf32>,
    return
  }
  func.func @transform_0(%arg0: i32) -> (i32, i32) {
    %c0_i32 = arith.constant 0 : i32
    %c0_i32_0 = arith.constant 0 : i32
    return %arg0, %c0_i32 : i32, i32
  }
  func.func @transform_1(%arg0: i32) -> (i32, i32) {
    %c0_i32 = arith.constant 0 : i32
    %c0_i32_0 = arith.constant 0 : i32
    %c0_i32_1 = arith.constant 0 : i32
    return %c0_i32, %c0_i32_0 : i32, i32
  }
  func.func @transform_2(%arg0: i32) -> (i32, i32) {
    %c0_i32 = arith.constant 0 : i32
    %c0_i32_0 = arith.constant 0 : i32
    %c0_i32_1 = arith.constant 0 : i32
    return %c0_i32, %c0_i32_0 : i32, i32
  }
  func.func @transform_3(%arg0: i32) -> (i32, i32) {
    %c0_i32 = arith.constant 0 : i32
    %c0_i32_0 = arith.constant 0 : i32
    return %arg0, %c0_i32 : i32, i32
  }
}

module attributes {stable_mosaic.version = 11 : i64} {
  func.func @_swiglu_kernel_resident(%arg0: i32, %arg1: memref<8x128xf32, #tpu.memory_space<vmem>>, %arg2: memref<128x256xf32, #tpu.memory_space<vmem>>, %arg3: memref<128x128xf32, #tpu.memory_space<vmem>>, %arg4: memref<8x128xf32, #tpu.memory_space<vmem>>) attributes {dimension_semantics = [#tpu.dimension_semantics<parallel>], iteration_bounds = array<i64: 2>, scalar_prefetch = 0 : i64, scratch_operands = 0 : i64, tpu.core_type = #tpu.core_type<tc>, window_params = [{transform_indices = @transform_0, window_bounds = array<i64: 8, 128>}, {pipeline_mode = #tpu.pipeline_mode<synchronous>, transform_indices = @transform_1, window_bounds = array<i64: 128, 256>}, {pipeline_mode = #tpu.pipeline_mode<synchronous>, transform_indices = @transform_2, window_bounds = array<i64: 128, 128>}, {transform_indices = @transform_3, window_bounds = array<i64: 8, 128>}]} {
    %c0 = arith.constant 0 : index
    %c0_0 = arith.constant 0 : index
    %0 = vector.load %arg1[%c0, %c0_0] : memref<8x128xf32, #tpu.memory_space<vmem>>, vector<8x128xf32>
    %c0_1 = arith.constant 0 : index
    %c0_2 = arith.constant 0 : index
    %1 = vector.load %arg2[%c0_1, %c0_2] : memref<128x256xf32, #tpu.memory_space<vmem>>, vector<128x256xf32>
    %cst = arith.constant dense<0.000000e+00> : vector<8x256xf32>
    %2 = tpu.matmul %0, %1, %cst {dimension_numbers = #tpu.dot_dimension_numbers<[1], [0], [0], [1], [0, 0, 1, 1], [], []>} : vector<8x128xf32>, vector<128x256xf32>, vector<8x256xf32> -> vector<8x256xf32>
    %3 = vector.extract_strided_slice %2 {offsets = [0, 0], sizes = [8, 128], strides = [1, 1]} : vector<8x256xf32> to vector<8x128xf32>
    %4 = vector.extract_strided_slice %2 {offsets = [0, 128], sizes = [8, 128], strides = [1, 1]} : vector<8x256xf32> to vector<8x128xf32>
    %5 = arith.negf %3 : vector<8x128xf32>
    %6 = math.exp %5 : vector<8x128xf32>
    %cst_3 = arith.constant 1.000000e+00 : f32
    %7 = vector.broadcast %cst_3 : f32 to vector<8x128xf32>
    %8 = arith.addf %7, %6 : vector<8x128xf32>
    %9 = arith.divf %7, %8 : vector<8x128xf32>
    %10 = arith.mulf %3, %9 : vector<8x128xf32>
    %11 = arith.mulf %10, %4 : vector<8x128xf32>
    %c0_4 = arith.constant 0 : index
    %c0_5 = arith.constant 0 : index
    %12 = vector.load %arg3[%c0_4, %c0_5] : memref<128x128xf32, #tpu.memory_space<vmem>>, vector<128x128xf32>
    %cst_6 = arith.constant dense<0.000000e+00> : vector<8x128xf32>
    %13 = tpu.matmul %11, %12, %cst_6 {dimension_numbers = #tpu.dot_dimension_numbers<[1], [0], [0], [1], [0, 0, 1, 1], [], []>} : vector<8x128xf32>, vector<128x128xf32>, vector<8x128xf32> -> vector<8x128xf32>
    %c0_7 = arith.constant 0 : index
    %c0_8 = arith.constant 0 : index
    %14 = vector.load %arg4[%c0_7, %c0_8] : memref<8x128xf32, #tpu.memory_space<vmem>>, vector<8x128xf32>
    tpu.vector_store %arg4[%c0_7, %c0_8], %13 {strides = array<i32>} : memref<8x128xf32, #tpu.memory_space<vmem>>, vector<8x128xf32>,
    return
  }
  func.func @transform_0(%arg0: i32) -> (i32, i32) {
    %c0_i32 = arith.constant 0 : i32
    %c0_i32_0 = arith.constant 0 : i32
    return %arg0, %c0_i32 : i32, i32
  }
  func.func @transform_1(%arg0: i32) -> (i32, i32) {
    %c0_i32 = arith.constant 0 : i32
    %c0_i32_0 = arith.constant 0 : i32
    %c0_i32_1 = arith.constant 0 : i32
    return %c0_i32, %c0_i32_0 : i32, i32
  }
  func.func @transform_2(%arg0: i32) -> (i32, i32) {
    %c0_i32 = arith.constant 0 : i32
    %c0_i32_0 = arith.constant 0 : i32
    %c0_i32_1 = arith.constant 0 : i32
    return %c0_i32, %c0_i32_0 : i32, i32
  }
  func.func @transform_3(%arg0: i32) -> (i32, i32) {
    %c0_i32 = arith.constant 0 : i32
    %c0_i32_0 = arith.constant 0 : i32
    return %arg0, %c0_i32 : i32, i32
  }
}

</mosaic_0001>

<bundles_post_ra>
// kernel: tpu_custom_call.1
= control target key start
LH: loop header
LB: loop body
LE: loop exit
PB: predicated region body
PF: predicated region fallthrough
CT: control target
= control target key end

     0   :  { %8 = vsyncpa [#allocation3], 0  ;;  %s889_s0 = inlined_call_operand.hbm [shape: f32[16,128], index: 0, kind: input, shape index: {}]   ;;  %s890_s1 = inlined_call_operand.hbm [shape: f32[128,256], index: 1, kind: input, shape index: {}]   ;;  %s891_s2 = inlined_call_operand.hbm [shape: f32[128,128], index: 2, kind: input, shape index: {}]   ;;  %s892_s3 = inlined_call_operand.hbm [shape: f32[16,128], index: 3, kind: output, shape index: {}]  }
   0x1   :  { %10 = vsyncpa [#allocation3 + $0x1], 0 }
   0x2   :  { %11 = vsyncpa [#allocation6], 0 }
   0x3   :  { %12 = vsyncpa [#allocation4], 0 }
   0x4   :  { %14 = vsyncpa [#allocation4 + $0x1], 0  ;;  %s737_s12 = smov 0   ;;  %s739_s13 = smov 0  }
   0x5   :  { %s741_s14 = smov 0   ;;  %s743_s15 = smov 0  }
   0x6 LB: > { %s130_s18 = sshll.u32 %s890_s1, 4  ;;  %s761_s19 = sadd.s32 4294967295, %s709_s15   ;;  %s709_s15 = sphi %s743_s15, %s903_s15   ;;  %s705_s14 = sphi %s741_s14, %s902_s14   ;;  %s701_s13 = sphi %s739_s13, %s901_s13   ;;  %s697_s12 = sphi %s737_s12, %s900_s12   ;;  %s131_s18 = int_to_ptr.hbm [resolvable:$true] %s130_s18 }
   0x7   : > { %p458_p0 = scmp.ge.s32.totalorder %s709_s15, 1  ;;  %p41_p1 = scmp.eq.s32.totalorder %s761_s19, 0 }
   0x8   : > { %p119_p2 = scmp.lt.s32.totalorder %s709_s15, 3  ;;  %s711_s21 = smov [#allocation5]  }
   0x9   : > { %s132_s22 = sshll.u32 %s711_s21, 4  ;;  %s144_s25 = sshll.u32 %s891_s2, 4  ;;  %s133_s22 = int_to_ptr.vmem [resolvable:$true] %s132_s22  ;;  %s145_s25 = int_to_ptr.hbm [resolvable:$true] %s144_s25 }
   0xa   : > { %p766_p3 = pnand %p458_p0, %p119_p2  ;;  %s712_s26 = smov [#allocation7]  }
   0xb   : > { %s146_s27 = sshll.u32 %s712_s26, 4  ;;  %s713_s28 = smov 256   ;;  %s147_s27 = int_to_ptr.vmem [resolvable:$true] %s146_s27 }
   0xc   : > { %p486_p4 = pneg %p766_p3  ;;  %s714_s29 = smov 16  }
   0xd   : > { %s715_s30 = smov 128   ;;  %s716_s4 = smov 8  }
   0xe   : > { %p487_p6 = pnand %p486_p4, %p41_p1  ;;  %s457_s5 = sadd.s32 4294967294, %s709_s15  }
   0xf   : > { %s780_s6 = sadd.s32 1, %s709_s15   ;;  %s27_s8 = sadd.s32 1, %s705_s14 }
  0x10   : > { %489 = dma.hbm_to_vmem [thread:$0]  (!%p487_p6), %s131_s18, 4096, %s133_s22, [#allocation6], %s713_s28, %s713_s28, %s714_s29  }
  0x11   : > { %492 = dma.hbm_to_vmem [thread:$0]  (!%p487_p6), %s145_s25, 2048, %s147_s27, [#allocation6], %s715_s30, %s715_s30, %s716_s4  }
  0x12   : > { %s24_s7 = ssub.s32 %s709_s15, %s780_s6  ;;  %p34_p8 = scmp.ne.s32.totalorder %s705_s14, %s701_s13 }
  0x13   : > { %p25_p7 = scmp.eq.s32.totalorder %s24_s7, 0  ;;  %p35_p9 = scmp.eq.s32.totalorder %s709_s15, 0 }
  0x14   : > { %p40_p10 = scmp.ne.s32.totalorder %s701_s13, %s697_s12  ;;  %p106_p13 = scmp.eq.s32.totalorder %s761_s19, 1 }
  0x15   : > { %s791_s9 = scalar_select %p25_p7, %s705_s14, %s27_s8  }
  0x16   : > { %p793_p11 = por %p35_p9, %p34_p8  ;;  %p799_p12 = por %p41_p1, %p40_p10 }
  0x17   : > { %p112_p0 = scmp.eq.s32.totalorder %s457_s5, 1  ;;  %p503_p2 = scmp.lt.s32.totalorder %s709_s15, 2 }
  0x18   : > { %s160_s16 = sand.u32 1, %s705_s14   ;;  %p806_p4 = por %p106_p13, %p34_p8 }
  0x19   : > { %p810_p6 = por %p112_p0, %p40_p10  ;;  %s462_s21 = sshll.u32 %s160_s16, 3 }
  0x1a   : > { %s463_s22 = sshll.u32 %s709_s15, 3  ;;  %s164_s26 = scalar_lea.vmem [#allocation2], %s462_s21 }
  0x1b   : > { %s168_s25 = scalar_lea.hbm %s889_s0, %s463_s22  ;;  %s172_s27 = sshll.u32 %s164_s26, 4  ;;  %s173_s27 = int_to_ptr.vmem [resolvable:$true] %s172_s27 }
  0x1c   : > { %s170_s28 = sshll.u32 %s168_s25, 4  ;;  %p820_p7 = pnand %p503_p2, %p793_p11  ;;  %s171_s28 = int_to_ptr.hbm [resolvable:$true] %s170_s28 }
  0x1d   : > { %s161_s30 = scalar_lea.sflag [#allocation3], %s160_s16  ;;  %s609_s4 = sshra.s32 %s171_s28, 4  ;;  %s610_s4 = int_to_ptr.hbm [resolvable:$true] %s609_s4 }
  0x1e   : > { %s611_s5 = scalar_lea.hbm %s610_s4, 8  ;;  %p613_p9 = pneg %p820_p7 }
  0x1f   : > { %p612_p8 = scmp.ne.s32.totalorder %s610_s4, %s611_s5  ;;  %s616_s21 = scalar_lea.hbm %s889_s0, 16 }
  0x20   : > { %p617_p11 = scmp.lt.s32.totalorder %s610_s4, %s889_s0  ;;  %p618_p0 = scmp.lt.s32.totalorder %s616_s21, %s611_s5 }
  0x21   : > { %p614_p10 = pnand %p613_p9, %p612_p8 }
  0x22   : > { %p619_p2 = por %p618_p0, %p617_p11 }
  0x23   : > { %p615_p13 = pneg %p614_p10 }
  0x25   : > { %p620_p5 = pnand %p619_p2, %p615_p13 }
  0x27   : > { %623 = shalt.err (!%p620_p5)
}
  0x28   : > { %496 = dma.hbm_to_vmem [thread:$0]  (!%p820_p7), %s171_s28, 128, %s173_s27, %s161_s30  }
  0x29   : > { %181 = sbr.rel (%p766_p3) target bundleno = 374 (0x176), region = 32  ;;  %s837_s16 = sand.u32 (!%p766_p3), 1, %s701_s13  }
  0x2a   : > { %s465_s23 = sshll.u32 (!%p766_p3), %s837_s16, 3  ;;  %s184_s24 = scalar_lea.sflag (!%p766_p3), [#allocation3], %s837_s16 }
  0x2b   : > { %s843_s25 = scalar_lea.vmem (!%p766_p3), [#allocation2], %s465_s23 }
  0x2e   : > { %684 = dma.done.wait (%p799_p12), %s184_s24, 128  }
  0x2f   : > { %686 = vsyncadd (%p799_p12), %s184_s24, 4294967168 }
  0x30   : > { %688 = dma.done.wait (%p41_p1), [#allocation6], 6144  }
  0x31   : > { %690 = vsyncadd (%p41_p1), [#allocation6], 4294961152  ;;  %v252_v0 = vld [vmem:[#allocation5 + $0xf0] sm:$0xff]  ;;  %v250_v1 = vld [vmem:[#allocation5 + $0xe0] sm:$0xff]  ;;  %s471_s20 = sshll.u32 %s761_s19, 3  ;;  %s220_s28 = scalar_lea.vmem [#allocation8], %s465_s23 }
  0x32   : > { %254 = vmatpush.msra.mxu0 %v252_v0  ;;  %v248_v2 = vld [vmem:[#allocation5 + $0xd0] sm:$0xff]  ;;  %v246_v3 = vld [vmem:[#allocation5 + $0xc0] sm:$0xff]  ;;  %v253_v4 = vld [vmem:[#allocation5 + $0xf8] sm:$0xff]  ;;  %s363_s27 = scalar_lea.hbm %s892_s3, %s471_s20  ;;  %s365_s29 = sshll.u32 %s220_s28, 4  ;;  %s366_s29 = int_to_ptr.vmem [resolvable:$true] %s365_s29 }
  0x33   : > { %v244_v5 = vld [vmem:[#allocation5 + $0xb0] sm:$0xff]  ;;  %274 = vmatpush.msra.mxu1 %v253_v4  ;;  %v251_v6 = vld [vmem:[#allocation5 + $0xe8] sm:$0xff]  ;;  %v249_v7 = vld [vmem:[#allocation5 + $0xd8] sm:$0xff]  ;;  %s367_s30 = sshll.u32 %s363_s27, 4  ;;  %s353_s4 = scalar_lea.sflag [#allocation4], %s837_s16  ;;  %s368_s30 = int_to_ptr.hbm [resolvable:$true] %s367_s30 }
  0x34   : > { %255 = vmatpush.msra.mxu0 %v250_v1  ;;  %v242_v8 = vld [vmem:[#allocation5 + $0xa0] sm:$0xff]  ;;  %v247_v9 = vld [vmem:[#allocation5 + $0xc8] sm:$0xff]  ;;  %v240_v10 = vld [vmem:[#allocation5 + $0x90] sm:$0xff]  ;;  %s653_s5 = sshra.s32 %s368_s30, 4  ;;  %s659_s21 = scalar_lea.hbm %s892_s3, 16  ;;  %s654_s5 = int_to_ptr.hbm [resolvable:$true] %s653_s5 }
  0x35   : > { %275 = vmatpush.msra.mxu1 %v251_v6  ;;  %v245_v11 = vld [vmem:[#allocation5 + $0xb8] sm:$0xff]  ;;  %v238_v12 = vld [vmem:[#allocation5 + $0x80] sm:$0xff]  ;;  %v243_v13 = vld [vmem:[#allocation5 + $0xa8] sm:$0xff]  ;;  %s655_s7 = scalar_lea.hbm %s654_s5, 8  ;;  %p660_p12 = scmp.lt.s32.totalorder %s654_s5, %s892_s3 }
  0x36   : > { %256 = vmatpush.msra.mxu0 %v248_v2  ;;  %v236_v14 = vld [vmem:[#allocation5 + $0x70] sm:$0xff]  ;;  %v241_v15 = vld [vmem:[#allocation5 + $0x98] sm:$0xff]  ;;  %v234_v16 = vld [vmem:[#allocation5 + $0x60] sm:$0xff]  ;;  %p656_p1 = scmp.ne.s32.totalorder %s654_s5, %s655_s7  ;;  %p661_p7 = scmp.lt.s32.totalorder %s659_s21, %s655_s7 }
  0x37   : > { %276 = vmatpush.msra.mxu1 %v249_v7  ;;  %v239_v17 = vld [vmem:[#allocation5 + $0x88] sm:$0xff]  ;;  %v232_v18 = vld [vmem:[#allocation5 + $0x50] sm:$0xff]  ;;  %v237_v19 = vld [vmem:[#allocation5 + $0x78] sm:$0xff] }
  0x38   : > { %257 = vmatpush.msra.mxu0 %v246_v3  ;;  %v230_v20 = vld [vmem:[#allocation5 + $0x40] sm:$0xff]  ;;  %v235_v21 = vld [vmem:[#allocation5 + $0x68] sm:$0xff]  ;;  %v228_v22 = vld [vmem:[#allocation5 + $0x30] sm:$0xff]  ;;  %p657_p3 = pnand %p656_p1, %p806_p4  ;;  %p662_p8 = por %p661_p7, %p660_p12 }
  0x39   : > { %277 = vmatpush.msra.mxu1 %v247_v9  ;;  %v233_v23 = vld [vmem:[#allocation5 + $0x58] sm:$0xff]  ;;  %v226_v24 = vld [vmem:[#allocation5 + $0x20] sm:$0xff]  ;;  %v231_v25 = vld [vmem:[#allocation5 + $0x48] sm:$0xff] }
  0x3a   : > { %258 = vmatpush.msra.mxu0 %v244_v5  ;;  %v224_v26 = vld [vmem:[#allocation5 + $0x10] sm:$0xff]  ;;  %v229_v27 = vld [vmem:[#allocation5 + $0x38] sm:$0xff]  ;;  %v222_v28 = vld [vmem:[#allocation5] sm:$0xff]  ;;  %p658_p5 = pneg %p657_p3 }
  0x3b   : > { %278 = vmatpush.msra.mxu1 %v245_v11  ;;  %v221_v29 = vld [vmem:[%s843_s25] sm:$0xff]  ;;  %v227_v30 = vld [vmem:[#allocation5 + $0x28] sm:$0xff]  ;;  %v327_v36 = vld [vmem:[#allocation7 + $0x60] sm:$0xff] }
  0x3c   : > { %259 = vmatpush.msra.mxu0 %v242_v8  ;;  %v225_v31 = vld [vmem:[#allocation5 + $0x18] sm:$0xff]  ;;  %v223_v32 = vld [vmem:[#allocation5 + $0x8] sm:$0xff]  ;;  %v329_v34 = vld [vmem:[#allocation7 + $0x70] sm:$0xff]  ;;  %p663_p9 = pnand %p662_p8, %p658_p5 }
  0x3d   : > { %279 = vmatpush.msra.mxu1 %v243_v13  ;;  %v330_v33 = vld [vmem:[#allocation7 + $0x78] sm:$0xff]  ;;  %v328_v35 = vld [vmem:[#allocation7 + $0x68] sm:$0xff]  ;;  %v325_v38 = vld [vmem:[#allocation7 + $0x50] sm:$0xff] }
  0x3e   : > { %260 = vmatpush.msra.mxu0 %v240_v10  ;;  %331 = vmatpush.msra.mxu2 %v330_v33  ;;  %v326_v37 = vld [vmem:[#allocation7 + $0x58] sm:$0xff]  ;;  %v324_v39 = vld [vmem:[#allocation7 + $0x48] sm:$0xff]  ;;  %v323_v40 = vld [vmem:[#allocation7 + $0x40] sm:$0xff] }
  0x3f   : > { %280 = vmatpush.msra.mxu1 %v241_v15  ;;  %v322_v41 = vld [vmem:[#allocation7 + $0x38] sm:$0xff]  ;;  %v321_v42 = vld [vmem:[#allocation7 + $0x30] sm:$0xff]  ;;  %v320_v43 = vld [vmem:[#allocation7 + $0x28] sm:$0xff] }
  0x40   : > { %261 = vmatpush.msra.mxu0 %v238_v12  ;;  %332 = vmatpush.msra.mxu2 %v329_v34  ;;  %v319_v44 = vld [vmem:[#allocation7 + $0x20] sm:$0xff]  ;;  %v318_v45 = vld [vmem:[#allocation7 + $0x18] sm:$0xff]  ;;  %v317_v46 = vld [vmem:[#allocation7 + $0x10] sm:$0xff] }
  0x41   : > { %281 = vmatpush.msra.mxu1 %v239_v17  ;;  %v316_v47 = vld [vmem:[#allocation7 + $0x8] sm:$0xff]  ;;  %v315_v48 = vld [vmem:[#allocation7] sm:$0xff] }
  0x42   : > { %262 = vmatpush.msra.mxu0 %v236_v14  ;;  %333 = vmatpush.msra.mxu2 %v328_v35 }
  0x43   : > { %282 = vmatpush.msra.mxu1 %v237_v19 }
  0x44   : > { %263 = vmatpush.msra.mxu0 %v234_v16  ;;  %334 = vmatpush.msra.mxu2 %v327_v36 }
  0x45   : > { %283 = vmatpush.msra.mxu1 %v235_v21 }
  0x46   : > { %264 = vmatpush.msra.mxu0 %v232_v18  ;;  %335 = vmatpush.msra.mxu2 %v326_v37 }
  0x47   : > { %284 = vmatpush.msra.mxu1 %v233_v23 }
  0x48   : > { %265 = vmatpush.msra.mxu0 %v230_v20  ;;  %336 = vmatpush.msra.mxu2 %v325_v38 }
  0x49   : > { %285 = vmatpush.msra.mxu1 %v231_v25 }
  0x4a   : > { %266 = vmatpush.msra.mxu0 %v228_v22  ;;  %337 = vmatpush.msra.mxu2 %v324_v39 }
  0x4b   : > { %286 = vmatpush.msra.mxu1 %v229_v27 }
  0x4c   : > { %267 = vmatpush.msra.mxu0 %v226_v24  ;;  %338 = vmatpush.msra.mxu2 %v323_v40 }
  0x4d   : > { %287 = vmatpush.msra.mxu1 %v227_v30 }
  0x4e   : > { %268 = vmatpush.msra.mxu0 %v224_v26  ;;  %339 = vmatpush.msra.mxu2 %v322_v41 }
  0x4f   : > { %288 = vmatpush.msra.mxu1 %v225_v31 }
  0x50   : > { %269 = vmatpush.msra.mxu0 %v222_v28  ;;  %340 = vmatpush.msra.mxu2 %v321_v42 }
  0x51   : > { %270 = vmatmul.f32.vlgmr.msra.gmra.mxu0 %v221_v29  ;;  %289 = vmatpush.msra.mxu1 %v223_v32 }
  0x52   : > { %290 = vmatmul.f32.vlgmr.msra.gmra.mxu1 %v221_v29  ;;  %341 = vmatpush.msra.mxu2 %v320_v43 }
  0x54   : > { %342 = vmatpush.msra.mxu2 %v319_v44 }
  0x56   : > { %343 = vmatpush.msra.mxu2 %v318_v45 }
  0x58   : > { %344 = vmatpush.msra.mxu2 %v317_v46 }
  0x5a   : > { %345 = vmatpush.msra.mxu2 %v316_v47 }
  0x5c   : > { %346 = vmatpush.msra.mxu2 %v315_v48 }
  0xce   : > { %v271_v49 = vpop.f32.mrf.mxu0 }
  0xcf   : > { %v469_v50 = vmul.f32 -1.442695, %v271_v49  ;;  %v291_v63 = vpop.f32.mrf.mxu1 }
  0xd1   : > { %545 = vpow2.f32 %v469_v50 }
  0xd7   : > { %v546_v51 = vpop.eup %545 }
  0xd8   : > { %v297_v52 = vadd.f32 1.0, %v546_v51 }
  0xda   : > { %547 = vrcp.f32 %v297_v52  ;;  %v309_v56 = vand.u32 2147483648, %v297_v52  ;;  %v307_v58 = vand.u32 2147483647, %v297_v52  ;;  %vm303_vm1 = vweird.f32 %v297_v52 }
  0xdc   : > { %v310_v60 = vor.u32 1.1754944e-38, %v309_v56  ;;  %vm308_vm3 = vcmp.eq.f32.partialorder %v307_v58, 8.507059e+37 }
  0xe0   : > { %v548_v53 = vpop.eup %547 }
  0xe1   : > { %v299_v54 = vmul.f32 %v548_v53, %v297_v52  ;;  %vm304_vm0 = vweird.f32 %v548_v53 }
  0xe2   : > { %vm305_vm2 = vmor %vm303_vm1, %vm304_vm0 }
  0xe3   : > { %v300_v55 = vsub.f32 1.0, %v299_v54 }
  0xe5   : > { %v301_v57 = vmul.f32 %v548_v53, %v300_v55 }
  0xe7   : > { %v302_v59 = vadd.f32 %v548_v53, %v301_v57 }
  0xe9   : > { %v306_v61 = vsel %vm305_vm2, %v548_v53, %v302_v59 }
  0xea   : > { %v311_v62 = vsel %vm308_vm3, %v310_v60, %v306_v61 }
  0xeb   : > { %v313_v0 = vmul.f32 %v311_v62, %v271_v49 }
  0xed   : > { %v314_v1 = vmul.f32 %v313_v0, %v291_v63 }
  0xef   : > { %347 = vmatmul.f32.vlgmr.msra.gmra.mxu2 %v314_v1 }
 0x172   : > { %v348_v2 = vpop.f32.mrf.mxu2 }
 0x173   : > { %351 = vst [vmem:[%s220_s28] sm:$0xff] %v348_v2 }
 0x174   : > { %666 = shalt.err (!%p663_p9)
}
 0x175   : > { %484 = dma.vmem_to_hbm [thread:$0]  (%p806_p4), %s366_s29, 128, %s368_s30, %s353_s4  }
 0x176 PF: > { %s379_s16 = sand.u32 1, %s697_s12   ;;  %p899_p10 = scmp.ge.s32.totalorder %s709_s15, 2 }
 0x177   : > { %s380_s23 = scalar_lea.sflag [#allocation4], %s379_s16 }
 0x178   : > { %p498_p13 = pnand %p899_p10, %p810_p6 }
 0x17a   : > { %p499_p11 = pneg %p498_p13 }
 0x17c   : > { %692 = dma.done.wait (%p499_p11), %s380_s23, 128  }
 0x17d   : > { %694 = vsyncadd (%p499_p11), %s380_s23, 4294967168  ;;  %p17_p0 = scmp.ge.s32.totalorder %s780_s6, 4   ;;  %s900_s12 = smov %s701_s13 }
 0x17e   : > { %s901_s13 = smov %s705_s14  ;;  %s902_s14 = smov %s791_s9 }
 0x17f   : > { %s903_s15 = smov %s780_s6  ;;  %19 = sbr.rel (!%p17_p0) target bundleno = 6 (0x6), region = 85 }
 0x184   :  { %386 = vsyncpa [#allocation3], 1 }
 0x185   :  { %388 = vsyncpa [#allocation3 + $0x1], 1 }
 0x186   :  { %389 = vsyncpa [#allocation6], 1 }
 0x187   :  { %390 = vsyncpa [#allocation4], 1 }
 0x188   :  { %392 = vsyncpa [#allocation4 + $0x1], 1 }

// kernel: tpu_custom_call.1
= control target key start
LH: loop header
LB: loop body
LE: loop exit
PB: predicated region body
PF: predicated region fallthrough
CT: control target
= control target key end

     0   :  { %8 = vsyncpa [#allocation3], 0  ;;  %s889_s0 = inlined_call_operand.hbm [shape: f32[16,128], index: 0, kind: input, shape index: {}]   ;;  %s890_s1 = inlined_call_operand.hbm [shape: f32[128,256], index: 1, kind: input, shape index: {}]   ;;  %s891_s2 = inlined_call_operand.hbm [shape: f32[128,128], index: 2, kind: input, shape index: {}]   ;;  %s892_s3 = inlined_call_operand.hbm [shape: f32[16,128], index: 3, kind: output, shape index: {}]  }
   0x1   :  { %10 = vsyncpa [#allocation3 + $0x1], 0 }
   0x2   :  { %11 = vsyncpa [#allocation6], 0 }
   0x3   :  { %12 = vsyncpa [#allocation4], 0 }
   0x4   :  { %14 = vsyncpa [#allocation4 + $0x1], 0  ;;  %s737_s12 = smov 0   ;;  %s739_s13 = smov 0  }
   0x5   :  { %s741_s14 = smov 0   ;;  %s743_s15 = smov 0  }
   0x6 LB: > { %s130_s18 = sshll.u32 %s890_s1, 4  ;;  %s761_s19 = sadd.s32 4294967295, %s709_s15   ;;  %s709_s15 = sphi %s743_s15, %s903_s15   ;;  %s705_s14 = sphi %s741_s14, %s902_s14   ;;  %s701_s13 = sphi %s739_s13, %s901_s13   ;;  %s697_s12 = sphi %s737_s12, %s900_s12   ;;  %s131_s18 = int_to_ptr.hbm [resolvable:$true] %s130_s18 }
   0x7   : > { %p458_p0 = scmp.ge.s32.totalorder %s709_s15, 1  ;;  %p41_p1 = scmp.eq.s32.totalorder %s761_s19, 0 }
   0x8   : > { %p119_p2 = scmp.lt.s32.totalorder %s709_s15, 3  ;;  %s711_s21 = smov [#allocation5]  }
   0x9   : > { %s132_s22 = sshll.u32 %s711_s21, 4  ;;  %s144_s25 = sshll.u32 %s891_s2, 4  ;;  %s133_s22 = int_to_ptr.vmem [resolvable:$true] %s132_s22  ;;  %s145_s25 = int_to_ptr.hbm [resolvable:$true] %s144_s25 }
   0xa   : > { %p766_p3 = pnand %p458_p0, %p119_p2  ;;  %s712_s26 = smov [#allocation7]  }
   0xb   : > { %s146_s27 = sshll.u32 %s712_s26, 4  ;;  %s713_s28 = smov 256   ;;  %s147_s27 = int_to_ptr.vmem [resolvable:$true] %s146_s27 }
   0xc   : > { %p486_p4 = pneg %p766_p3  ;;  %s714_s29 = smov 16  }
   0xd   : > { %s715_s30 = smov 128   ;;  %s716_s4 = smov 8  }
   0xe   : > { %p487_p6 = pnand %p486_p4, %p41_p1  ;;  %s457_s5 = sadd.s32 4294967294, %s709_s15  }
   0xf   : > { %s780_s6 = sadd.s32 1, %s709_s15   ;;  %s27_s8 = sadd.s32 1, %s705_s14 }
  0x10   : > { %489 = dma.hbm_to_vmem [thread:$0]  (!%p487_p6), %s131_s18, 4096, %s133_s22, [#allocation6], %s713_s28, %s713_s28, %s714_s29  }
  0x11   : > { %492 = dma.hbm_to_vmem [thread:$0]  (!%p487_p6), %s145_s25, 2048, %s147_s27, [#allocation6], %s715_s30, %s715_s30, %s716_s4  }
  0x12   : > { %s24_s7 = ssub.s32 %s709_s15, %s780_s6  ;;  %p34_p8 = scmp.ne.s32.totalorder %s705_s14, %s701_s13 }
  0x13   : > { %p25_p7 = scmp.eq.s32.totalorder %s24_s7, 0  ;;  %p35_p9 = scmp.eq.s32.totalorder %s709_s15, 0 }
  0x14   : > { %p40_p10 = scmp.ne.s32.totalorder %s701_s13, %s697_s12  ;;  %p106_p13 = scmp.eq.s32.totalorder %s761_s19, 1 }
  0x15   : > { %s791_s9 = scalar_select %p25_p7, %s705_s14, %s27_s8  }
  0x16   : > { %p793_p11 = por %p35_p9, %p34_p8  ;;  %p799_p12 = por %p41_p1, %p40_p10 }
  0x17   : > { %p112_p0 = scmp.eq.s32.totalorder %s457_s5, 1  ;;  %p503_p2 = scmp.lt.s32.totalorder %s709_s15, 2 }
  0x18   : > { %s160_s16 = sand.u32 1, %s705_s14   ;;  %p806_p4 = por %p106_p13, %p34_p8 }
  0x19   : > { %p810_p6 = por %p112_p0, %p40_p10  ;;  %s462_s21 = sshll.u32 %s160_s16, 3 }
  0x1a   : > { %s463_s22 = sshll.u32 %s709_s15, 3  ;;  %s164_s26 = scalar_lea.vmem [#allocation2], %s462_s21 }
  0x1b   : > { %s168_s25 = scalar_lea.hbm %s889_s0, %s463_s22  ;;  %s172_s27 = sshll.u32 %s164_s26, 4  ;;  %s173_s27 = int_to_ptr.vmem [resolvable:$true] %s172_s27 }
  0x1c   : > { %s170_s28 = sshll.u32 %s168_s25, 4  ;;  %p820_p7 = pnand %p503_p2, %p793_p11  ;;  %s171_s28 = int_to_ptr.hbm [resolvable:$true] %s170_s28 }
  0x1d   : > { %s161_s30 = scalar_lea.sflag [#allocation3], %s160_s16  ;;  %s609_s4 = sshra.s32 %s171_s28, 4  ;;  %s610_s4 = int_to_ptr.hbm [resolvable:$true] %s609_s4 }
  0x1e   : > { %s611_s5 = scalar_lea.hbm %s610_s4, 8  ;;  %p613_p9 = pneg %p820_p7 }
  0x1f   : > { %p612_p8 = scmp.ne.s32.totalorder %s610_s4, %s611_s5  ;;  %s616_s21 = scalar_lea.hbm %s889_s0, 16 }
  0x20   : > { %p617_p11 = scmp.lt.s32.totalorder %s610_s4, %s889_s0  ;;  %p618_p0 = scmp.lt.s32.totalorder %s616_s21, %s611_s5 }
  0x21   : > { %p614_p10 = pnand %p613_p9, %p612_p8 }
  0x22   : > { %p619_p2 = por %p618_p0, %p617_p11 }
  0x23   : > { %p615_p13 = pneg %p614_p10 }
  0x25   : > { %p620_p5 = pnand %p619_p2, %p615_p13 }
  0x27   : > { %623 = shalt.err (!%p620_p5)
}
  0x28   : > { %496 = dma.hbm_to_vmem [thread:$0]  (!%p820_p7), %s171_s28, 128, %s173_s27, %s161_s30  }
  0x29   : > { %181 = sbr.rel (%p766_p3) target bundleno = 374 (0x176), region = 32  ;;  %s837_s16 = sand.u32 (!%p766_p3), 1, %s701_s13  }
  0x2a   : > { %s465_s23 = sshll.u32 (!%p766_p3), %s837_s16, 3  ;;  %s184_s24 = scalar_lea.sflag (!%p766_p3), [#allocation3], %s837_s16 }
  0x2b   : > { %s843_s25 = scalar_lea.vmem (!%p766_p3), [#allocation2], %s465_s23 }
  0x2e   : > { %684 = dma.done.wait (%p799_p12), %s184_s24, 128  }
  0x2f   : > { %686 = vsyncadd (%p799_p12), %s184_s24, 4294967168 }
  0x30   : > { %688 = dma.done.wait (%p41_p1), [#allocation6], 6144  }
  0x31   : > { %690 = vsyncadd (%p41_p1), [#allocation6], 4294961152  ;;  %v252_v0 = vld [vmem:[#allocation5 + $0xf0] sm:$0xff]  ;;  %v250_v1 = vld [vmem:[#allocation5 + $0xe0] sm:$0xff]  ;;  %s471_s20 = sshll.u32 %s761_s19, 3  ;;  %s220_s28 = scalar_lea.vmem [#allocation8], %s465_s23 }
  0x32   : > { %254 = vmatpush.msra.mxu0 %v252_v0  ;;  %v248_v2 = vld [vmem:[#allocation5 + $0xd0] sm:$0xff]  ;;  %v246_v3 = vld [vmem:[#allocation5 + $0xc0] sm:$0xff]  ;;  %v253_v4 = vld [vmem:[#allocation5 + $0xf8] sm:$0xff]  ;;  %s363_s27 = scalar_lea.hbm %s892_s3, %s471_s20  ;;  %s365_s29 = sshll.u32 %s220_s28, 4  ;;  %s366_s29 = int_to_ptr.vmem [resolvable:$true] %s365_s29 }
  0x33   : > { %v244_v5 = vld [vmem:[#allocation5 + $0xb0] sm:$0xff]  ;;  %274 = vmatpush.msra.mxu1 %v253_v4  ;;  %v251_v6 = vld [vmem:[#allocation5 + $0xe8] sm:$0xff]  ;;  %v249_v7 = vld [vmem:[#allocation5 + $0xd8] sm:$0xff]  ;;  %s367_s30 = sshll.u32 %s363_s27, 4  ;;  %s353_s4 = scalar_lea.sflag [#allocation4], %s837_s16  ;;  %s368_s30 = int_to_ptr.hbm [resolvable:$true] %s367_s30 }
  0x34   : > { %255 = vmatpush.msra.mxu0 %v250_v1  ;;  %v242_v8 = vld [vmem:[#allocation5 + $0xa0] sm:$0xff]  ;;  %v247_v9 = vld [vmem:[#allocation5 + $0xc8] sm:$0xff]  ;;  %v240_v10 = vld [vmem:[#allocation5 + $0x90] sm:$0xff]  ;;  %s653_s5 = sshra.s32 %s368_s30, 4  ;;  %s659_s21 = scalar_lea.hbm %s892_s3, 16  ;;  %s654_s5 = int_to_ptr.hbm [resolvable:$true] %s653_s5 }
  0x35   : > { %275 = vmatpush.msra.mxu1 %v251_v6  ;;  %v245_v11 = vld [vmem:[#allocation5 + $0xb8] sm:$0xff]  ;;  %v238_v12 = vld [vmem:[#allocation5 + $0x80] sm:$0xff]  ;;  %v243_v13 = vld [vmem:[#allocation5 + $0xa8] sm:$0xff]  ;;  %s655_s7 = scalar_lea.hbm %s654_s5, 8  ;;  %p660_p12 = scmp.lt.s32.totalorder %s654_s5, %s892_s3 }
  0x36   : > { %256 = vmatpush.msra.mxu0 %v248_v2  ;;  %v236_v14 = vld [vmem:[#allocation5 + $0x70] sm:$0xff]  ;;  %v241_v15 = vld [vmem:[#allocation5 + $0x98] sm:$0xff]  ;;  %v234_v16 = vld [vmem:[#allocation5 + $0x60] sm:$0xff]  ;;  %p656_p1 = scmp.ne.s32.totalorder %s654_s5, %s655_s7  ;;  %p661_p7 = scmp.lt.s32.totalorder %s659_s21, %s655_s7 }
  0x37   : > { %276 = vmatpush.msra.mxu1 %v249_v7  ;;  %v239_v17 = vld [vmem:[#allocation5 + $0x88] sm:$0xff]  ;;  %v232_v18 = vld [vmem:[#allocation5 + $0x50] sm:$0xff]  ;;  %v237_v19 = vld [vmem:[#allocation5 + $0x78] sm:$0xff] }
  0x38   : > { %257 = vmatpush.msra.mxu0 %v246_v3  ;;  %v230_v20 = vld [vmem:[#allocation5 + $0x40] sm:$0xff]  ;;  %v235_v21 = vld [vmem:[#allocation5 + $0x68] sm:$0xff]  ;;  %v228_v22 = vld [vmem:[#allocation5 + $0x30] sm:$0xff]  ;;  %p657_p3 = pnand %p656_p1, %p806_p4  ;;  %p662_p8 = por %p661_p7, %p660_p12 }
  0x39   : > { %277 = vmatpush.msra.mxu1 %v247_v9  ;;  %v233_v23 = vld [vmem:[#allocation5 + $0x58] sm:$0xff]  ;;  %v226_v24 = vld [vmem:[#allocation5 + $0x20] sm:$0xff]  ;;  %v231_v25 = vld [vmem:[#allocation5 + $0x48] sm:$0xff] }
  0x3a   : > { %258 = vmatpush.msra.mxu0 %v244_v5  ;;  %v224_v26 = vld [vmem:[#allocation5 + $0x10] sm:$0xff]  ;;  %v229_v27 = vld [vmem:[#allocation5 + $0x38] sm:$0xff]  ;;  %v222_v28 = vld [vmem:[#allocation5] sm:$0xff]  ;;  %p658_p5 = pneg %p657_p3 }
  0x3b   : > { %278 = vmatpush.msra.mxu1 %v245_v11  ;;  %v221_v29 = vld [vmem:[%s843_s25] sm:$0xff]  ;;  %v227_v30 = vld [vmem:[#allocation5 + $0x28] sm:$0xff]  ;;  %v327_v36 = vld [vmem:[#allocation7 + $0x60] sm:$0xff] }
  0x3c   : > { %259 = vmatpush.msra.mxu0 %v242_v8  ;;  %v225_v31 = vld [vmem:[#allocation5 + $0x18] sm:$0xff]  ;;  %v223_v32 = vld [vmem:[#allocation5 + $0x8] sm:$0xff]  ;;  %v329_v34 = vld [vmem:[#allocation7 + $0x70] sm:$0xff]  ;;  %p663_p9 = pnand %p662_p8, %p658_p5 }
  0x3d   : > { %279 = vmatpush.msra.mxu1 %v243_v13  ;;  %v330_v33 = vld [vmem:[#allocation7 + $0x78] sm:$0xff]  ;;  %v328_v35 = vld [vmem:[#allocation7 + $0x68] sm:$0xff]  ;;  %v325_v38 = vld [vmem:[#allocation7 + $0x50] sm:$0xff] }
  0x3e   : > { %260 = vmatpush.msra.mxu0 %v240_v10  ;;  %331 = vmatpush.msra.mxu2 %v330_v33  ;;  %v326_v37 = vld [vmem:[#allocation7 + $0x58] sm:$0xff]  ;;  %v324_v39 = vld [vmem:[#allocation7 + $0x48] sm:$0xff]  ;;  %v323_v40 = vld [vmem:[#allocation7 + $0x40] sm:$0xff] }
  0x3f   : > { %280 = vmatpush.msra.mxu1 %v241_v15  ;;  %v322_v41 = vld [vmem:[#allocation7 + $0x38] sm:$0xff]  ;;  %v321_v42 = vld [vmem:[#allocation7 + $0x30] sm:$0xff]  ;;  %v320_v43 = vld [vmem:[#allocation7 + $0x28] sm:$0xff] }
  0x40   : > { %261 = vmatpush.msra.mxu0 %v238_v12  ;;  %332 = vmatpush.msra.mxu2 %v329_v34  ;;  %v319_v44 = vld [vmem:[#allocation7 + $0x20] sm:$0xff]  ;;  %v318_v45 = vld [vmem:[#allocation7 + $0x18] sm:$0xff]  ;;  %v317_v46 = vld [vmem:[#allocation7 + $0x10] sm:$0xff] }
  0x41   : > { %281 = vmatpush.msra.mxu1 %v239_v17  ;;  %v316_v47 = vld [vmem:[#allocation7 + $0x8] sm:$0xff]  ;;  %v315_v48 = vld [vmem:[#allocation7] sm:$0xff] }
  0x42   : > { %262 = vmatpush.msra.mxu0 %v236_v14  ;;  %333 = vmatpush.msra.mxu2 %v328_v35 }
  0x43   : > { %282 = vmatpush.msra.mxu1 %v237_v19 }
  0x44   : > { %263 = vmatpush.msra.mxu0 %v234_v16  ;;  %334 = vmatpush.msra.mxu2 %v327_v36 }
  0x45   : > { %283 = vmatpush.msra.mxu1 %v235_v21 }
  0x46   : > { %264 = vmatpush.msra.mxu0 %v232_v18  ;;  %335 = vmatpush.msra.mxu2 %v326_v37 }
  0x47   : > { %284 = vmatpush.msra.mxu1 %v233_v23 }
  0x48   : > { %265 = vmatpush.msra.mxu0 %v230_v20  ;;  %336 = vmatpush.msra.mxu2 %v325_v38 }
  0x49   : > { %285 = vmatpush.msra.mxu1 %v231_v25 }
  0x4a   : > { %266 = vmatpush.msra.mxu0 %v228_v22  ;;  %337 = vmatpush.msra.mxu2 %v324_v39 }
  0x4b   : > { %286 = vmatpush.msra.mxu1 %v229_v27 }
  0x4c   : > { %267 = vmatpush.msra.mxu0 %v226_v24  ;;  %338 = vmatpush.msra.mxu2 %v323_v40 }
  0x4d   : > { %287 = vmatpush.msra.mxu1 %v227_v30 }
  0x4e   : > { %268 = vmatpush.msra.mxu0 %v224_v26  ;;  %339 = vmatpush.msra.mxu2 %v322_v41 }
  0x4f   : > { %288 = vmatpush.msra.mxu1 %v225_v31 }
  0x50   : > { %269 = vmatpush.msra.mxu0 %v222_v28  ;;  %340 = vmatpush.msra.mxu2 %v321_v42 }
  0x51   : > { %270 = vmatmul.f32.vlgmr.msra.gmra.mxu0 %v221_v29  ;;  %289 = vmatpush.msra.mxu1 %v223_v32 }
  0x52   : > { %290 = vmatmul.f32.vlgmr.msra.gmra.mxu1 %v221_v29  ;;  %341 = vmatpush.msra.mxu2 %v320_v43 }
  0x54   : > { %342 = vmatpush.msra.mxu2 %v319_v44 }
  0x56   : > { %343 = vmatpush.msra.mxu2 %v318_v45 }
  0x58   : > { %344 = vmatpush.msra.mxu2 %v317_v46 }
  0x5a   : > { %345 = vmatpush.msra.mxu2 %v316_v47 }
  0x5c   : > { %346 = vmatpush.msra.mxu2 %v315_v48 }
  0xce   : > { %v271_v49 = vpop.f32.mrf.mxu0 }
  0xcf   : > { %v469_v50 = vmul.f32 -1.442695, %v271_v49  ;;  %v291_v63 = vpop.f32.mrf.mxu1 }
  0xd1   : > { %545 = vpow2.f32 %v469_v50 }
  0xd7   : > { %v546_v51 = vpop.eup %545 }
  0xd8   : > { %v297_v52 = vadd.f32 1.0, %v546_v51 }
  0xda   : > { %547 = vrcp.f32 %v297_v52  ;;  %v309_v56 = vand.u32 2147483648, %v297_v52  ;;  %v307_v58 = vand.u32 2147483647, %v297_v52  ;;  %vm303_vm1 = vweird.f32 %v297_v52 }
  0xdc   : > { %v310_v60 = vor.u32 1.1754944e-38, %v309_v56  ;;  %vm308_vm3 = vcmp.eq.f32.partialorder %v307_v58, 8.507059e+37 }
  0xe0   : > { %v548_v53 = vpop.eup %547 }
  0xe1   : > { %v299_v54 = vmul.f32 %v548_v53, %v297_v52  ;;  %vm304_vm0 = vweird.f32 %v548_v53 }
  0xe2   : > { %vm305_vm2 = vmor %vm303_vm1, %vm304_vm0 }
  0xe3   : > { %v300_v55 = vsub.f32 1.0, %v299_v54 }
  0xe5   : > { %v301_v57 = vmul.f32 %v548_v53, %v300_v55 }
  0xe7   : > { %v302_v59 = vadd.f32 %v548_v53, %v301_v57 }
  0xe9   : > { %v306_v61 = vsel %vm305_vm2, %v548_v53, %v302_v59 }
  0xea   : > { %v311_v62 = vsel %vm308_vm3, %v310_v60, %v306_v61 }
  0xeb   : > { %v313_v0 = vmul.f32 %v311_v62, %v271_v49 }
  0xed   : > { %v314_v1 = vmul.f32 %v313_v0, %v291_v63 }
  0xef   : > { %347 = vmatmul.f32.vlgmr.msra.gmra.mxu2 %v314_v1 }
 0x172   : > { %v348_v2 = vpop.f32.mrf.mxu2 }
 0x173   : > { %351 = vst [vmem:[%s220_s28] sm:$0xff] %v348_v2 }
 0x174   : > { %666 = shalt.err (!%p663_p9)
}
 0x175   : > { %484 = dma.vmem_to_hbm [thread:$0]  (%p806_p4), %s366_s29, 128, %s368_s30, %s353_s4  }
 0x176 PF: > { %s379_s16 = sand.u32 1, %s697_s12   ;;  %p899_p10 = scmp.ge.s32.totalorder %s709_s15, 2 }
 0x177   : > { %s380_s23 = scalar_lea.sflag [#allocation4], %s379_s16 }
 0x178   : > { %p498_p13 = pnand %p899_p10, %p810_p6 }
 0x17a   : > { %p499_p11 = pneg %p498_p13 }
 0x17c   : > { %692 = dma.done.wait (%p499_p11), %s380_s23, 128  }
 0x17d   : > { %694 = vsyncadd (%p499_p11), %s380_s23, 4294967168  ;;  %p17_p0 = scmp.ge.s32.totalorder %s780_s6, 4   ;;  %s900_s12 = smov %s701_s13 }
 0x17e   : > { %s901_s13 = smov %s705_s14  ;;  %s902_s14 = smov %s791_s9 }
 0x17f   : > { %s903_s15 = smov %s780_s6  ;;  %19 = sbr.rel (!%p17_p0) target bundleno = 6 (0x6), region = 85 }
 0x184   :  { %386 = vsyncpa [#allocation3], 1 }
 0x185   :  { %388 = vsyncpa [#allocation3 + $0x1], 1 }
 0x186   :  { %389 = vsyncpa [#allocation6], 1 }
 0x187   :  { %390 = vsyncpa [#allocation4], 1 }
 0x188   :  { %392 = vsyncpa [#allocation4 + $0x1], 1 }

</bundles_post_ra>
